<compile_context>
chip_gen: v7x
topology: tpu7x:2x2x1
jax: 0.10.0
libtpu: 0.0.40
codegen_flags: <defaults>
</compile_context>

<pallas_src>
import functools

import jax
import jax.numpy as jnp
from jax.experimental import pallas as pl
from jax.experimental.pallas import tpu as pltpu


HP = 128   # padded hidden / feature / output lane width (lane-dense for MXU)


# ----------------------------- Pallas kernel -------------------------------


def _gin_fused_kernel(x_ref, ea_ref, src_ref, dst_ref, bat_ref,
                      w_ref, b_ref, o_ref):
    """Whole GIN forward in one VMEM-resident block.

    x_ref:  [N, HP]  bf16 (feature-padded node features)
    ea_ref: [E, HP]  bf16 (feature-padded edge attrs)
    src_ref:[E, 1]   int32, dst_ref:[1, E] int32, bat_ref:[1, N] int32
    w_ref:  [K, HP, HP] bf16  (node_enc, edge_enc, (w1,w2) x L, fc)
    b_ref:  [K, 1, HP]  f32   (matching biases; BN folded into layer-1 bias)
    o_ref:  [G_PAD, HP] f32
    """
    n_nodes = x_ref.shape[0]
    n_edges = ea_ref.shape[0]
    g_pad = o_ref.shape[0]
    k_total = w_ref.shape[0]
    n_layers = (k_total - 3) // 2

    bf16 = jnp.bfloat16
    f32 = jnp.float32

    # encoders (bf16 operands, f32 accumulation on the MXU)
    h = jnp.dot(x_ref[...], w_ref[0], preferred_element_type=f32) + b_ref[0]
    ea = jnp.dot(ea_ref[...], w_ref[1], preferred_element_type=f32) + b_ref[1]

    # one-hot gather / scatter / pool matrices built in-register from indices
    # (exact in bf16: entries are 0.0 / 1.0)
    gmat = (jax.lax.broadcasted_iota(jnp.int32, (n_edges, n_nodes), 1)
            == src_ref[...]).astype(bf16)                       # [E, N]
    smat = (jax.lax.broadcasted_iota(jnp.int32, (n_nodes, n_edges), 0)
            == dst_ref[...]).astype(bf16)                       # [N, E]
    pmat = (jax.lax.broadcasted_iota(jnp.int32, (g_pad, n_nodes), 0)
            == bat_ref[...]).astype(bf16)                       # [G_PAD, N]

    # n_layers is static at trace time -> unrolled Python loop
    for l in range(n_layers):
        # GINEConv (eps = 0): m_e = relu(x[src(e)] + ea_e); agg = scatter_add
        x_src = jnp.dot(gmat, h.astype(bf16), preferred_element_type=f32)
        m = jnp.maximum(x_src + ea, 0.0)
        agg = jnp.dot(smat, m.astype(bf16), preferred_element_type=f32)
        hh = h + agg                                            # eps = 0
        # MLP: Linear (BN folded in) -> ReLU -> Linear ; then layer ReLU
        z = (jnp.dot(hh.astype(bf16), w_ref[2 + 2 * l],
                     preferred_element_type=f32) + b_ref[2 + 2 * l])
        z = jnp.maximum(z, 0.0)
        z = (jnp.dot(z.astype(bf16), w_ref[3 + 2 * l],
                     preferred_element_type=f32) + b_ref[3 + 2 * l])
        h = jnp.maximum(z, 0.0)   # forward(): relu(conv(x)); dropout id (eval)

    # global_add_pool + fc_out, lane-dense, sublane-padded [G_PAD, HP] store
    pooled = jnp.dot(pmat, h.astype(bf16), preferred_element_type=f32)
    o_ref[...] = (jnp.dot(pooled.astype(bf16), w_ref[k_total - 1],
                          preferred_element_type=f32) + b_ref[k_total - 1])


# ------------------------------ pallas_call glue ----------------------------


_VMEM_SPEC = pl.BlockSpec(memory_space=pltpu.MemorySpace.VMEM)


def _fused_call(x_pad, ea_pad, src, dst, bat, W, B, g_pad):
    args = (x_pad, ea_pad, src, dst, bat, W, B)
    return pl.pallas_call(
        _gin_fused_kernel,
        out_shape=jax.ShapeDtypeStruct((g_pad, HP), jnp.float32),
        in_specs=[_VMEM_SPEC] * len(args),
        out_specs=_VMEM_SPEC,
        compiler_params=pltpu.CompilerParams(
            vmem_limit_bytes=32 * 1024 * 1024,
        ),
    )(*args)


# --------------------------- host-side param prep ---------------------------


def _pad2(a, rows, cols):
    return jnp.pad(a, ((0, rows - a.shape[0]), (0, cols - a.shape[1])))


def prepare_params(params):
    """Fold BN (eval) into w1/b1, pad everything to [HP,HP]/[1,HP], stack.

    Run ONCE per model; the returned pytree lives on device and is reused by
    every jitted forward call.
    """
    out_dim = params["fc_w"].shape[1]

    Ws = [_pad2(params["node_enc_w"], HP, HP),
          _pad2(params["edge_enc_w"], HP, HP)]
    Bs = [_pad2(params["node_enc_b"], 1, HP),
          _pad2(params["edge_enc_b"], 1, HP)]

    for p in params["convs"]:
        inv_std = jax.lax.rsqrt(p["var"] + 1e-5)          # [1, H]
        scale = p["gamma"] * inv_std                      # [1, H]
        w1f = p["w1"] * scale                             # fold BN into Linear
        b1f = (p["b1"] - p["mean"]) * scale + p["beta"]
        Ws += [_pad2(w1f, HP, HP), _pad2(p["w2"], HP, HP)]
        Bs += [_pad2(b1f, 1, HP), _pad2(p["b2"], 1, HP)]

    Ws.append(_pad2(params["fc_w"], HP, HP))
    Bs.append(_pad2(params["fc_b"], 1, HP))

    prepared = {
        "W": jnp.stack(Ws).astype(jnp.bfloat16),   # [K, HP, HP]
        "B": jnp.stack(Bs).astype(jnp.float32),    # [K, 1, HP]
    }
    return prepared, out_dim


# ------------------------------- GIN forward --------------------------------


@functools.partial(jax.jit, static_argnames=("num_graphs", "out_dim"))
def gin_forward(prepared, x, edge_index, batch, edge_attr, *, num_graphs, out_dim):
    """jit'ed forward: pad inputs, one fused pallas_call, slice result."""
    x_pad = jnp.pad(x, ((0, 0), (0, HP - x.shape[1]))).astype(jnp.bfloat16)
    ea_pad = jnp.pad(edge_attr,
                     ((0, 0), (0, HP - edge_attr.shape[1]))).astype(jnp.bfloat16)

    src = edge_index[0].astype(jnp.int32).reshape(-1, 1)    # [E, 1]
    dst = edge_index[1].astype(jnp.int32).reshape(1, -1)    # [1, E]
    bat = batch.astype(jnp.int32).reshape(1, -1)            # [1, N]

    g_pad = max(8, -(-num_graphs // 8) * 8)                 # sublane-dense store
    out_padded = _fused_call(x_pad, ea_pad, src, dst, bat,
                             prepared["W"], prepared["B"], g_pad)
    return out_padded[:num_graphs, :out_dim]


# ------------------------------ references (JAX) -----------------------------


def gin_forward_ref_f32(params, x, edge_index, batch, edge_attr, num_graphs):
    """Pure f32 module semantics (eval mode): the ground truth."""
    src, dst = edge_index[0], edge_index[1]
    h = x @ params["node_enc_w"] + params["node_enc_b"]
    ea = edge_attr @ params["edge_enc_w"] + params["edge_enc_b"]
    for p in params["convs"]:
        m = jnp.maximum(h[src] + ea, 0.0)
        agg = jnp.zeros_like(h).at[dst].add(m)
        z = (h + agg) @ p["w1"] + p["b1"]
        z = (z - p["mean"]) * jax.lax.rsqrt(p["var"] + 1e-5) * p["gamma"] + p["beta"]
        z = jnp.maximum(z, 0.0)
        z = z @ p["w2"] + p["b2"]
        h = jnp.maximum(z, 0.0)
    pooled = jnp.zeros((num_graphs, h.shape[1]), h.dtype).at[batch].add(h)
    return pooled @ params["fc_w"] + params["fc_b"]


def gin_forward_ref_mixed(prepared, x, edge_index, batch, edge_attr,
                          num_graphs, out_dim):
    """Same bf16-operand / f32-accumulate recipe as the kernel, but using plain
    JAX gather / scatter (validates the kernel's data movement tightly)."""
    bf16, f32 = jnp.bfloat16, jnp.float32
    W, B = prepared["W"], prepared["B"]
    n_layers = (W.shape[0] - 3) // 2
    src, dst = edge_index[0], edge_index[1]

    xb = jnp.pad(x, ((0, 0), (0, HP - x.shape[1]))).astype(bf16)
    eab = jnp.pad(edge_attr, ((0, 0), (0, HP - edge_attr.shape[1]))).astype(bf16)
    h = jnp.dot(xb, W[0], preferred_element_type=f32) + B[0]
    ea = jnp.dot(eab, W[1], preferred_element_type=f32) + B[1]

    for l in range(n_layers):
        x_src = h.astype(bf16).astype(f32)[src]
        m = jnp.maximum(x_src + ea, 0.0)
        agg = jnp.zeros_like(h).at[dst].add(m.astype(bf16).astype(f32))
        hh = h + agg
        z = jnp.dot(hh.astype(bf16), W[2 + 2 * l],
                    preferred_element_type=f32) + B[2 + 2 * l]
        z = jnp.maximum(z, 0.0)
        z = jnp.dot(z.astype(bf16), W[3 + 2 * l],
                    preferred_element_type=f32) + B[3 + 2 * l]
        h = jnp.maximum(z, 0.0)

    pooled = jnp.zeros((num_graphs, HP), f32).at[batch].add(
        h.astype(bf16).astype(f32))
    out = jnp.dot(pooled.astype(bf16), W[W.shape[0] - 1],
                  preferred_element_type=f32) + B[W.shape[0] - 1]
    return out[:, :out_dim]


# --------------------------------- params ------------------------------------


def make_params(key, x_dim, edge_attr_dim, hidden, n_layers, out_dim):
    ks = jax.random.split(key, 8 + 8 * n_layers)
    k = iter(ks)

    def lin(kk, fin, fout):
        return jax.random.normal(kk, (fin, fout), jnp.float32) * (1.0 / jnp.sqrt(fin))

    params = {
        "node_enc_w": lin(next(k), x_dim, hidden),
        "node_enc_b": jax.random.normal(next(k), (1, hidden), jnp.float32) * 0.1,
        "edge_enc_w": lin(next(k), edge_attr_dim, hidden),
        "edge_enc_b": jax.random.normal(next(k), (1, hidden), jnp.float32) * 0.1,
        "convs": [],
    }
    for _ in range(n_layers):
        layer = {
            "w1": lin(next(k), hidden, hidden),
            "b1": jax.random.normal(next(k), (1, hidden), jnp.float32) * 0.1,
            "gamma": 1.0 + 0.05 * jnp.arange(hidden, dtype=jnp.float32)[None, :] / hidden,
            "beta": 0.02 * jnp.arange(hidden, dtype=jnp.float32)[None, :] / hidden,
            "mean": jax.random.normal(next(k), (1, hidden), jnp.float32) * 0.05,
            "var": 1.0 + jax.random.uniform(next(k), (1, hidden), jnp.float32) * 0.1,
            "w2": lin(next(k), hidden, hidden),
            "b2": jax.random.normal(next(k), (1, hidden), jnp.float32) * 0.1,
        }
        params["convs"].append(layer)
    params["fc_w"] = lin(next(k), hidden, out_dim)
    params["fc_b"] = jax.random.normal(next(k), (1, out_dim), jnp.float32) * 0.1
    return params


# --------------------------------- main --------------------------------------


if __name__ == "__main__":
    # model_config-equivalent: n_layers=2, hidden_size=32, dropout_p=0.3 (eval),
    # use_edge_attr=True; x_dim=16, edge_attr_dim=8, num_class=3, multi_label=False
    N_NODES, N_EDGES, N_GRAPHS = 32, 64, 2
    X_DIM, EDGE_ATTR_DIM, HIDDEN, N_LAYERS, NUM_CLASS = 16, 8, 32, 2, 3

    key = jax.random.PRNGKey(0)
    k_x, k_ea, k_ei, k_p = jax.random.split(key, 4)

    x = jax.random.normal(k_x, (N_NODES, X_DIM), jnp.float32)
    edge_attr = jax.random.normal(k_ea, (N_EDGES, EDGE_ATTR_DIM), jnp.float32)
    edge_index = jax.random.randint(k_ei, (2, N_EDGES), 0, N_NODES, jnp.int32)
    # first half of nodes -> graph 0, second half -> graph 1
    batch = jnp.concatenate(
        [jnp.zeros(N_NODES // 2, jnp.int32), jnp.ones(N_NODES - N_NODES // 2, jnp.int32)]
    )

    params = make_params(k_p, X_DIM, EDGE_ATTR_DIM, HIDDEN, N_LAYERS, NUM_CLASS)

    # one-time param prep (BN fold, padding, stacking, bf16) -> cached on device
    prepared, out_dim = prepare_params(params)
    prepared = jax.tree_util.tree_map(jax.block_until_ready, prepared)

    out = gin_forward(prepared, x, edge_index, batch, edge_attr,
                      num_graphs=N_GRAPHS, out_dim=out_dim)
    out = jax.block_until_ready(out)
    assert out.shape == (N_GRAPHS, NUM_CLASS), out.shape

    # Tight check vs a JAX reference using the same bf16-operand recipe
    ref_mixed = gin_forward_ref_mixed(prepared, x, edge_index, batch, edge_attr,
                                      N_GRAPHS, out_dim)
    ref_mixed = jax.block_until_ready(ref_mixed)
    assert jnp.allclose(out, ref_mixed, atol=2e-3, rtol=2e-3), (out, ref_mixed)

    # Loose check vs the exact f32 module semantics (bf16 MXU-operand drift)
    ref_f32 = gin_forward_ref_f32(params, x, edge_index, batch, edge_attr, N_GRAPHS)
    ref_f32 = jax.block_until_ready(ref_f32)
    assert jnp.allclose(out, ref_f32, atol=0.2, rtol=0.05), (out, ref_f32)

    print("KERNEL_OK")
</pallas_src>

<mosaic_0001>
module attributes {stable_mosaic.version = 11 : i64} {
  func.func @_gin_fused_kernel(%arg0: memref<32x128xbf16, #tpu.memory_space<vmem>>, %arg1: memref<64x128xbf16, #tpu.memory_space<vmem>>, %arg2: memref<64x1xi32, #tpu.memory_space<vmem>>, %arg3: memref<1x64xi32, #tpu.memory_space<vmem>>, %arg4: memref<1x32xi32, #tpu.memory_space<vmem>>, %arg5: memref<7x128x128xbf16, #tpu.memory_space<vmem>>, %arg6: memref<7x1x128xf32, #tpu.memory_space<vmem>>, %arg7: memref<8x128xf32, #tpu.memory_space<vmem>>) attributes {dimension_semantics = [], scalar_prefetch = 0 : i64, scratch_operands = 0 : i64, tpu.core_type = #tpu.core_type<tc>} {
    %c0 = arith.constant 0 : index
    %c0_0 = arith.constant 0 : index
    %0 = vector.load %arg0[%c0, %c0_0] : memref<32x128xbf16, #tpu.memory_space<vmem>>, vector<32x128xbf16>
    %c0_1 = arith.constant 0 : index
    %c0_2 = arith.constant 0 : index
    %c0_3 = arith.constant 0 : index
    %1 = vector.load %arg5[%c0_1, %c0_2, %c0_3] : memref<7x128x128xbf16, #tpu.memory_space<vmem>>, vector<1x128x128xbf16>
    %2 = vector.shape_cast %1 : vector<1x128x128xbf16> to vector<128x128xbf16>
    %cst = arith.constant dense<0.000000e+00> : vector<32x128xf32>
    %3 = tpu.matmul %0, %2, %cst {dimension_numbers = #tpu.dot_dimension_numbers<[1], [0], [0], [1], [0, 0, 1, 1], [], []>} : vector<32x128xbf16>, vector<128x128xbf16>, vector<32x128xf32> -> vector<32x128xf32>
    %c0_4 = arith.constant 0 : index
    %c0_5 = arith.constant 0 : index
    %c0_6 = arith.constant 0 : index
    %4 = vector.load %arg6[%c0_4, %c0_5, %c0_6] : memref<7x1x128xf32, #tpu.memory_space<vmem>>, vector<1x1x128xf32>
    %5 = vector.shape_cast %4 : vector<1x1x128xf32> to vector<1x128xf32>
    %6 = vector.broadcast %5 : vector<1x128xf32> to vector<32x128xf32>
    %7 = arith.addf %3, %6 : vector<32x128xf32>
    %c0_7 = arith.constant 0 : index
    %c0_8 = arith.constant 0 : index
    %8 = vector.load %arg1[%c0_7, %c0_8] : memref<64x128xbf16, #tpu.memory_space<vmem>>, vector<64x128xbf16>
    %c1 = arith.constant 1 : index
    %c0_9 = arith.constant 0 : index
    %c0_10 = arith.constant 0 : index
    %9 = vector.load %arg5[%c1, %c0_9, %c0_10] : memref<7x128x128xbf16, #tpu.memory_space<vmem>>, vector<1x128x128xbf16>
    %10 = vector.shape_cast %9 : vector<1x128x128xbf16> to vector<128x128xbf16>
    %cst_11 = arith.constant dense<0.000000e+00> : vector<64x128xf32>
    %11 = tpu.matmul %8, %10, %cst_11 {dimension_numbers = #tpu.dot_dimension_numbers<[1], [0], [0], [1], [0, 0, 1, 1], [], []>} : vector<64x128xbf16>, vector<128x128xbf16>, vector<64x128xf32> -> vector<64x128xf32>
    %c1_12 = arith.constant 1 : index
    %c0_13 = arith.constant 0 : index
    %c0_14 = arith.constant 0 : index
    %12 = vector.load %arg6[%c1_12, %c0_13, %c0_14] : memref<7x1x128xf32, #tpu.memory_space<vmem>>, vector<1x1x128xf32>
    %13 = vector.shape_cast %12 : vector<1x1x128xf32> to vector<1x128xf32>
    %14 = vector.broadcast %13 : vector<1x128xf32> to vector<64x128xf32>
    %15 = arith.addf %11, %14 : vector<64x128xf32>
    %16 = tpu.iota {dimensions = array<i32: 1>} : vector<64x32xi32>
    %c0_15 = arith.constant 0 : index
    %c0_16 = arith.constant 0 : index
    %17 = vector.load %arg2[%c0_15, %c0_16] : memref<64x1xi32, #tpu.memory_space<vmem>>, vector<64x1xi32>
    %18 = vector.broadcast %17 : vector<64x1xi32> to vector<64x32xi32>
    %19 = arith.cmpi eq, %16, %18 : vector<64x32xi32>
    %20 = arith.extui %19 : vector<64x32xi1> to vector<64x32xi32>
    %21 = arith.sitofp %20 : vector<64x32xi32> to vector<64x32xf32>
    %22 = arith.truncf %21 : vector<64x32xf32> to vector<64x32xbf16>
    %23 = tpu.iota {dimensions = array<i32: 0>} : vector<32x64xi32>
    %c0_17 = arith.constant 0 : index
    %c0_18 = arith.constant 0 : index
    %24 = vector.load %arg3[%c0_17, %c0_18] : memref<1x64xi32, #tpu.memory_space<vmem>>, vector<1x64xi32>
    %25 = vector.broadcast %24 : vector<1x64xi32> to vector<32x64xi32>
    %26 = arith.cmpi eq, %23, %25 : vector<32x64xi32>
    %27 = arith.extui %26 : vector<32x64xi1> to vector<32x64xi32>
    %28 = arith.sitofp %27 : vector<32x64xi32> to vector<32x64xf32>
    %29 = arith.truncf %28 : vector<32x64xf32> to vector<32x64xbf16>
    %30 = tpu.iota {dimensions = array<i32: 0>} : vector<8x32xi32>
    %c0_19 = arith.constant 0 : index
    %c0_20 = arith.constant 0 : index
    %31 = vector.load %arg4[%c0_19, %c0_20] : memref<1x32xi32, #tpu.memory_space<vmem>>, vector<1x32xi32>
    %32 = vector.broadcast %31 : vector<1x32xi32> to vector<8x32xi32>
    %33 = arith.cmpi eq, %30, %32 : vector<8x32xi32>
    %34 = arith.extui %33 : vector<8x32xi1> to vector<8x32xi32>
    %35 = arith.sitofp %34 : vector<8x32xi32> to vector<8x32xf32>
    %36 = arith.truncf %35 : vector<8x32xf32> to vector<8x32xbf16>
    %37 = arith.truncf %7 : vector<32x128xf32> to vector<32x128xbf16>
    %cst_21 = arith.constant dense<0.000000e+00> : vector<64x128xf32>
    %38 = tpu.matmul %22, %37, %cst_21 {dimension_numbers = #tpu.dot_dimension_numbers<[1], [0], [0], [1], [0, 0, 1, 1], [], []>} : vector<64x32xbf16>, vector<32x128xbf16>, vector<64x128xf32> -> vector<64x128xf32>
    %39 = arith.addf %38, %15 : vector<64x128xf32>
    %cst_22 = arith.constant 0.000000e+00 : f32
    %40 = vector.broadcast %cst_22 : f32 to vector<64x128xf32>
    %41 = arith.maximumf %39, %40 : vector<64x128xf32>
    %42 = arith.truncf %41 : vector<64x128xf32> to vector<64x128xbf16>
    %cst_23 = arith.constant dense<0.000000e+00> : vector<32x128xf32>
    %43 = tpu.matmul %29, %42, %cst_23 {dimension_numbers = #tpu.dot_dimension_numbers<[1], [0], [0], [1], [0, 0, 1, 1], [], []>} : vector<32x64xbf16>, vector<64x128xbf16>, vector<32x128xf32> -> vector<32x128xf32>
    %44 = arith.addf %7, %43 : vector<32x128xf32>
    %45 = arith.truncf %44 : vector<32x128xf32> to vector<32x128xbf16>
    %c2 = arith.constant 2 : index
    %c0_24 = arith.constant 0 : index
    %c0_25 = arith.constant 0 : index
    %46 = vector.load %arg5[%c2, %c0_24, %c0_25] : memref<7x128x128xbf16, #tpu.memory_space<vmem>>, vector<1x128x128xbf16>
    %47 = vector.shape_cast %46 : vector<1x128x128xbf16> to vector<128x128xbf16>
    %cst_26 = arith.constant dense<0.000000e+00> : vector<32x128xf32>
    %48 = tpu.matmul %45, %47, %cst_26 {dimension_numbers = #tpu.dot_dimension_numbers<[1], [0], [0], [1], [0, 0, 1, 1], [], []>} : vector<32x128xbf16>, vector<128x128xbf16>, vector<32x128xf32> -> vector<32x128xf32>
    %c2_27 = arith.constant 2 : index
    %c0_28 = arith.constant 0 : index
    %c0_29 = arith.constant 0 : index
    %49 = vector.load %arg6[%c2_27, %c0_28, %c0_29] : memref<7x1x128xf32, #tpu.memory_space<vmem>>, vector<1x1x128xf32>
    %50 = vector.shape_cast %49 : vector<1x1x128xf32> to vector<1x128xf32>
    %51 = vector.broadcast %50 : vector<1x128xf32> to vector<32x128xf32>
    %52 = arith.addf %48, %51 : vector<32x128xf32>
    %cst_30 = arith.constant 0.000000e+00 : f32
    %53 = vector.broadcast %cst_30 : f32 to vector<32x128xf32>
    %54 = arith.maximumf %52, %53 : vector<32x128xf32>
    %55 = arith.truncf %54 : vector<32x128xf32> to vector<32x128xbf16>
    %c3 = arith.constant 3 : index
    %c0_31 = arith.constant 0 : index
    %c0_32 = arith.constant 0 : index
    %56 = vector.load %arg5[%c3, %c0_31, %c0_32] : memref<7x128x128xbf16, #tpu.memory_space<vmem>>, vector<1x128x128xbf16>
    %57 = vector.shape_cast %56 : vector<1x128x128xbf16> to vector<128x128xbf16>
    %cst_33 = arith.constant dense<0.000000e+00> : vector<32x128xf32>
    %58 = tpu.matmul %55, %57, %cst_33 {dimension_numbers = #tpu.dot_dimension_numbers<[1], [0], [0], [1], [0, 0, 1, 1], [], []>} : vector<32x128xbf16>, vector<128x128xbf16>, vector<32x128xf32> -> vector<32x128xf32>
    %c3_34 = arith.constant 3 : index
    %c0_35 = arith.constant 0 : index
    %c0_36 = arith.constant 0 : index
    %59 = vector.load %arg6[%c3_34, %c0_35, %c0_36] : memref<7x1x128xf32, #tpu.memory_space<vmem>>, vector<1x1x128xf32>
    %60 = vector.shape_cast %59 : vector<1x1x128xf32> to vector<1x128xf32>
    %61 = vector.broadcast %60 : vector<1x128xf32> to vector<32x128xf32>
    %62 = arith.addf %58, %61 : vector<32x128xf32>
    %cst_37 = arith.constant 0.000000e+00 : f32
    %63 = vector.broadcast %cst_37 : f32 to vector<32x128xf32>
    %64 = arith.maximumf %62, %63 : vector<32x128xf32>
    %65 = arith.truncf %64 : vector<32x128xf32> to vector<32x128xbf16>
    %cst_38 = arith.constant dense<0.000000e+00> : vector<64x128xf32>
    %66 = tpu.matmul %22, %65, %cst_38 {dimension_numbers = #tpu.dot_dimension_numbers<[1], [0], [0], [1], [0, 0, 1, 1], [], []>} : vector<64x32xbf16>, vector<32x128xbf16>, vector<64x128xf32> -> vector<64x128xf32>
    %67 = arith.addf %66, %15 : vector<64x128xf32>
    %cst_39 = arith.constant 0.000000e+00 : f32
    %68 = vector.broadcast %cst_39 : f32 to vector<64x128xf32>
    %69 = arith.maximumf %67, %68 : vector<64x128xf32>
    %70 = arith.truncf %69 : vector<64x128xf32> to vector<64x128xbf16>
    %cst_40 = arith.constant dense<0.000000e+00> : vector<32x128xf32>
    %71 = tpu.matmul %29, %70, %cst_40 {dimension_numbers = #tpu.dot_dimension_numbers<[1], [0], [0], [1], [0, 0, 1, 1], [], []>} : vector<32x64xbf16>, vector<64x128xbf16>, vector<32x128xf32> -> vector<32x128xf32>
    %72 = arith.addf %64, %71 : vector<32x128xf32>
    %73 = arith.truncf %72 : vector<32x128xf32> to vector<32x128xbf16>
    %c4 = arith.constant 4 : index
    %c0_41 = arith.constant 0 : index
    %c0_42 = arith.constant 0 : index
    %74 = vector.load %arg5[%c4, %c0_41, %c0_42] : memref<7x128x128xbf16, #tpu.memory_space<vmem>>, vector<1x128x128xbf16>
    %75 = vector.shape_cast %74 : vector<1x128x128xbf16> to vector<128x128xbf16>
    %cst_43 = arith.constant dense<0.000000e+00> : vector<32x128xf32>
    %76 = tpu.matmul %73, %75, %cst_43 {dimension_numbers = #tpu.dot_dimension_numbers<[1], [0], [0], [1], [0, 0, 1, 1], [], []>} : vector<32x128xbf16>, vector<128x128xbf16>, vector<32x128xf32> -> vector<32x128xf32>
    %c4_44 = arith.constant 4 : index
    %c0_45 = arith.constant 0 : index
    %c0_46 = arith.constant 0 : index
    %77 = vector.load %arg6[%c4_44, %c0_45, %c0_46] : memref<7x1x128xf32, #tpu.memory_space<vmem>>, vector<1x1x128xf32>
    %78 = vector.shape_cast %77 : vector<1x1x128xf32> to vector<1x128xf32>
    %79 = vector.broadcast %78 : vector<1x128xf32> to vector<32x128xf32>
    %80 = arith.addf %76, %79 : vector<32x128xf32>
    %cst_47 = arith.constant 0.000000e+00 : f32
    %81 = vector.broadcast %cst_47 : f32 to vector<32x128xf32>
    %82 = arith.maximumf %80, %81 : vector<32x128xf32>
    %83 = arith.truncf %82 : vector<32x128xf32> to vector<32x128xbf16>
    %c5 = arith.constant 5 : index
    %c0_48 = arith.constant 0 : index
    %c0_49 = arith.constant 0 : index
    %84 = vector.load %arg5[%c5, %c0_48, %c0_49] : memref<7x128x128xbf16, #tpu.memory_space<vmem>>, vector<1x128x128xbf16>
    %85 = vector.shape_cast %84 : vector<1x128x128xbf16> to vector<128x128xbf16>
    %cst_50 = arith.constant dense<0.000000e+00> : vector<32x128xf32>
    %86 = tpu.matmul %83, %85, %cst_50 {dimension_numbers = #tpu.dot_dimension_numbers<[1], [0], [0], [1], [0, 0, 1, 1], [], []>} : vector<32x128xbf16>, vector<128x128xbf16>, vector<32x128xf32> -> vector<32x128xf32>
    %c5_51 = arith.constant 5 : index
    %c0_52 = arith.constant 0 : index
    %c0_53 = arith.constant 0 : index
    %87 = vector.load %arg6[%c5_51, %c0_52, %c0_53] : memref<7x1x128xf32, #tpu.memory_space<vmem>>, vector<1x1x128xf32>
    %88 = vector.shape_cast %87 : vector<1x1x128xf32> to vector<1x128xf32>
    %89 = vector.broadcast %88 : vector<1x128xf32> to vector<32x128xf32>
    %90 = arith.addf %86, %89 : vector<32x128xf32>
    %cst_54 = arith.constant 0.000000e+00 : f32
    %91 = vector.broadcast %cst_54 : f32 to vector<32x128xf32>
    %92 = arith.maximumf %90, %91 : vector<32x128xf32>
    %93 = arith.truncf %92 : vector<32x128xf32> to vector<32x128xbf16>
    %cst_55 = arith.constant dense<0.000000e+00> : vector<8x128xf32>
    %94 = tpu.matmul %36, %93, %cst_55 {dimension_numbers = #tpu.dot_dimension_numbers<[1], [0], [0], [1], [0, 0, 1, 1], [], []>} : vector<8x32xbf16>, vector<32x128xbf16>, vector<8x128xf32> -> vector<8x128xf32>
    %95 = arith.truncf %94 : vector<8x128xf32> to vector<8x128xbf16>
    %c6 = arith.constant 6 : index
    %c0_56 = arith.constant 0 : index
    %c0_57 = arith.constant 0 : index
    %96 = vector.load %arg5[%c6, %c0_56, %c0_57] : memref<7x128x128xbf16, #tpu.memory_space<vmem>>, vector<1x128x128xbf16>
    %97 = vector.shape_cast %96 : vector<1x128x128xbf16> to vector<128x128xbf16>
    %cst_58 = arith.constant dense<0.000000e+00> : vector<8x128xf32>
    %98 = tpu.matmul %95, %97, %cst_58 {dimension_numbers = #tpu.dot_dimension_numbers<[1], [0], [0], [1], [0, 0, 1, 1], [], []>} : vector<8x128xbf16>, vector<128x128xbf16>, vector<8x128xf32> -> vector<8x128xf32>
    %c6_59 = arith.constant 6 : index
    %c0_60 = arith.constant 0 : index
    %c0_61 = arith.constant 0 : index
    %99 = vector.load %arg6[%c6_59, %c0_60, %c0_61] : memref<7x1x128xf32, #tpu.memory_space<vmem>>, vector<1x1x128xf32>
    %100 = vector.shape_cast %99 : vector<1x1x128xf32> to vector<1x128xf32>
    %101 = vector.broadcast %100 : vector<1x128xf32> to vector<8x128xf32>
    %102 = arith.addf %98, %101 : vector<8x128xf32>
    %c0_62 = arith.constant 0 : index
    %c0_63 = arith.constant 0 : index
    %103 = vector.load %arg7[%c0_62, %c0_63] : memref<8x128xf32, #tpu.memory_space<vmem>>, vector<8x128xf32>
    tpu.vector_store %arg7[%c0_62, %c0_63], %102 {strides = array<i32>} : memref<8x128xf32, #tpu.memory_space<vmem>>, vector<8x128xf32>,
    return
  }
}

</mosaic_0001>

<bundles_post_ra>
// kernel: gin_forward.1
= control target key start
LH: loop header
LB: loop body
LE: loop exit
PB: predicated region body
PF: predicated region fallthrough
CT: control target
= control target key end

     0   :  { %12 = vsyncpa [#allocation3], 0  ;;  %s1898_s24 = smov [#allocation2]   ;;  %s2175_s0 = inlined_call_operand.vmem [shape: bf16[32,128], index: 0, kind: input, shape index: {}]   ;;  %s2176_s1 = inlined_call_operand.vmem [shape: bf16[64,128], index: 1, kind: input, shape index: {}]   ;;  %s2177_s2 = inlined_call_operand.vmem [shape: s32[64,1], index: 2, kind: input, shape index: {}]   ;;  %s2178_s3 = inlined_call_operand.vmem [shape: s32[1,64], index: 3, kind: input, shape index: {}]   ;;  %s2179_s4 = inlined_call_operand.vmem [shape: s32[1,32], index: 4, kind: input, shape index: {}]   ;;  %s2180_s5 = inlined_call_operand.hbm [shape: bf16[7,128,128], index: 5, kind: input, shape index: {}]   ;;  %s2181_s6 = inlined_call_operand.vmem [shape: f32[7,1,128], index: 6, kind: input, shape index: {}]   ;;  %s2182_s7 = inlined_call_operand.vmem [shape: f32[8,128], index: 7, kind: output, shape index: {}]  }
   0x1   :  { %s28_s25 = sshll.u32 %s1898_s24, 4  ;;  %s1874_s28 = scalar_lea.hbm %s2180_s5, 7168  ;;  %s29_s25 = int_to_ptr.vmem [resolvable:$true] %s28_s25 }
   0x2   :  { %p1875_p0 = scmp.ne.s32.totalorder %s2180_s5, %s1874_s28  ;;  %p1878_p1 = scmp.lt.u32.totalorder %s1874_s28, %s2180_s5 }
   0x4   :  { %p1880_p2 = pnand %p1878_p1, %p1875_p0 }
   0x6   :  { %1883 = shalt.err (!%p1880_p2)
}
   0x7   :  { %s1884_s10 = scalar_lea.vmem %s29_s25, 7168  ;;  %p1889_p4 = scmp.lt.s32.totalorder %s29_s25, %s29_s25 }
   0x8   :  { %p1885_p3 = scmp.ne.s32.totalorder %s29_s25, %s1884_s10  ;;  %p1890_p5 = scmp.lt.s32.totalorder %s1884_s10, %s1884_s10 }
   0xa   :  { %p1891_p6 = por %p1890_p5, %p1889_p4 }
   0xc   :  { %p1892_p7 = pnand %p1891_p6, %p1885_p3 }
   0xe   :  { %1895 = shalt.err (!%p1892_p7)
}
   0xf   :  { %s1899_s11 = smov 64   ;;  %s1900_s12 = smov 4  }
  0x10   :  { %34 = dma.hbm_to_vmem [thread:$0]  %s2180_s5, 7168, %s29_s25, [#allocation3], %s1899_s11, %s1899_s11, %s1900_s12  }
  0x11   :  { %1896 = dma.done.wait [#allocation3], 7168  }
  0x12   :  { %1897 = vsyncadd [#allocation3], 4294960128  ;;  %v1901_v0 = vmov 0   ;;  %v1812_v1 = vld [vmem:[#allocation2] sm:$0xff]   ;;  %v1813_v2 = vld [vmem:[#allocation2 + $0x8] sm:$0xff]   ;;  %v347_v29 = vlaneseq  ;;  %v1902_v34 = vmov 0.0  }
  0x13   :  { %1811 = vset.pattern.permute.xlu1 %v1901_v0  ;;  %1810 = vset.pattern.permute.xlu0 %v1901_v0  ;;  %v1814_v3 = vld [vmem:[#allocation2 + $0x10] sm:$0xff]   ;;  %v1815_v4 = vld [vmem:[#allocation2 + $0x18] sm:$0xff]   ;;  %v1820_v5 = vld [vmem:[%s2175_s0] sm:$0xff]   ;;  %vm444_vm2 = vcmask 261120   ;;  %vm534_vm11 = vcmask 523264   ;;  %vm1903_vm14 = vmmov 0  }
  0x14   :  { %1604 = vmatprep.subr.bf16.mxu0 %v1812_v1  ;;  %1620 = vmatprep.mubr.bf16.mxu0 %v1820_v5  ;;  %v351_v6 = vld [vmem:[%s2177_s2 + $0x10] sm:$0xff]  ;;  %v349_v7 = vld [vmem:[%s2177_s2] sm:$0xff]  ;;  %v352_v9 = vld [vmem:[%s2177_s2 + $0x18] sm:$0xff]  ;;  %v348_v32 = vand.u32 127, %v347_v29 }
  0x15   :  { %1605 = vmatpush3.bf16.msra.mxu0 %v1812_v1  ;;  %v1816_v8 = vld [vmem:[#allocation2 + $0x20] sm:$0xff]   ;;  %364 = vperm.xlu1 %1811, %v351_v6   ;;  %v350_v10 = vld [vmem:[%s2177_s2 + $0x8] sm:$0xff]  ;;  %v1818_v16 = vld [vmem:[#allocation2 + $0x30] sm:$0xff]  }
  0x16   :  { %1606 = vmatprep.subr.bf16.mxu0 %v1813_v2  ;;  %358 = vperm.xlu0 %1810, %v349_v7   ;;  %v1822_v11 = vld [vmem:[#allocation2 + $0x40] sm:$0xff]   ;;  %v1817_v12 = vld [vmem:[#allocation2 + $0x28] sm:$0xff]   ;;  %v356_v17 = vld [vmem:[%s2177_s2 + $0x38] sm:$0xff] }
  0x17   :  { %v354_v13 = vld [vmem:[%s2177_s2 + $0x28] sm:$0xff]  ;;  %v353_v14 = vld [vmem:[%s2177_s2 + $0x20] sm:$0xff]  ;;  %1624 = vmatprep.subr.bf16.mxu1 %v1822_v11  ;;  %v355_v18 = vld [vmem:[%s2177_s2 + $0x30] sm:$0xff] }
  0x18   :  { %v1823_v15 = vld [vmem:[#allocation2 + $0x48] sm:$0xff]   ;;  %1625 = vmatpush3.bf16.msra.mxu1 %v1822_v11  ;;  %v1824_v19 = vld [vmem:[#allocation2 + $0x50] sm:$0xff]   ;;  %v1825_v20 = vld [vmem:[#allocation2 + $0x58] sm:$0xff]  }
  0x19   :  { %1607 = vmatpush3.bf16.msra.mxu0 %v1813_v2  ;;  %367 = vperm.xlu1 %1811, %v352_v9   ;;  %v1819_v21 = vld [vmem:[#allocation2 + $0x38] sm:$0xff]   ;;  %v1826_v22 = vld [vmem:[#allocation2 + $0x60] sm:$0xff]   ;;  %v1821_v23 = vld [vmem:[%s2175_s0 + $0x8] sm:$0xff]   ;;  %v2037_v9 = vshrl.u32 %v347_v29, 7 }
  0x1a   :  { %1608 = vmatprep.subr.bf16.mxu0 %v1814_v3  ;;  %361 = vperm.xlu0 %1810, %v350_v10   ;;  %v1827_v24 = vld [vmem:[#allocation2 + $0x68] sm:$0xff]   ;;  %v1828_v25 = vld [vmem:[#allocation2 + $0x70] sm:$0xff]   ;;  %v1829_v26 = vld [vmem:[#allocation2 + $0x78] sm:$0xff]  }
  0x1b   :  { %1626 = vmatprep.subr.bf16.mxu1 %v1823_v15  ;;  %v1830_v27 = vld [vmem:[%s2176_s1] sm:$0xff]   ;;  %v1831_v28 = vld [vmem:[%s2176_s1 + $0x8] sm:$0xff]   ;;  %v1832_v30 = vld [vmem:[%s2176_s1 + $0x10] sm:$0xff]   ;;  %v411_v10 = vadd.s32 8, %v2037_v9 }
  0x1c   :  { %1627 = vmatpush3.bf16.msra.mxu1 %v1823_v15  ;;  %1640 = vmatprep.mubr.bf16.mxu1 %v1830_v27  ;;  %v1833_v31 = vld [vmem:[%s2176_s1 + $0x18] sm:$0xff]   ;;  %v1403_v42 = vld [vmem:[%s2181_s6] ss:$0 sm:$0xff]  ;;  %v1415_v15 = vld [vmem:[%s2181_s6 + $0x1] ss:$0 sm:$0xff] }
  0x1d   :  { %1609 = vmatpush3.bf16.msra.mxu0 %v1814_v3  ;;  %373 = vperm.xlu1 %1811, %v354_v13   ;;  %v1436_v11 = vld [vmem:[%s2178_s3] ss:$0 sm:$0xff] }
  0x1e   :  { %1610 = vmatprep.subr.bf16.mxu0 %v1815_v4  ;;  %370 = vperm.xlu0 %1810, %v353_v14   ;;  %vm419_vm9 = vcmp.eq.s32.totalorder %v2037_v9, %v1436_v11  ;;  %vm420_vm10 = vcmp.eq.s32.totalorder %v411_v10, %v1436_v11  ;;  %v1841_v10 = vld [vmem:[#allocation2 + $0xb8] sm:$0xff]  }
  0x1f   :  { %1628 = vmatprep.subr.bf16.mxu1 %v1824_v19  ;;  %v1438_v13 = vsel %vm420_vm10, 1.0, %v1902_v34 }
  0x20   :  { %1629 = vmatpush3.bf16.msra.mxu1 %v1824_v19 }
  0x21   :  { %1611 = vmatpush3.bf16.msra.mxu0 %v1815_v4  ;;  %379 = vperm.xlu1 %1811, %v356_v17  }
  0x22   :  { %1612 = vmatprep.subr.bf16.mxu0 %v1816_v8  ;;  %376 = vperm.xlu0 %1810, %v355_v18  }
  0x23   :  { %1630 = vmatprep.subr.bf16.mxu1 %v1825_v20 }
  0x24   :  { %1631 = vmatpush3.bf16.msra.mxu1 %v1825_v20 }
  0x25   :  { %1613 = vmatpush3.bf16.msra.mxu0 %v1816_v8  ;;  %1632 = vmatprep.subr.bf16.mxu1 %v1826_v22 }
  0x26   :  { %1614 = vmatprep.subr.bf16.mxu0 %v1817_v12 }
  0x28   :  { %1633 = vmatpush3.bf16.msra.mxu1 %v1826_v22 }
  0x29   :  { %1615 = vmatpush3.bf16.msra.mxu0 %v1817_v12  ;;  %1634 = vmatprep.subr.bf16.mxu1 %v1827_v24  ;;  %v1437_v12 = vsel %vm419_vm9, 1.0, %v1902_v34 }
  0x2a   :  { %1616 = vmatprep.subr.bf16.mxu0 %v1818_v16  ;;  %v2046_v14 = vpack.c.bf16 %v1438_v13, %v1437_v12  ;;  %v1843_v12 = vld [vmem:[#allocation2 + $0xc8] sm:$0xff]   ;;  %v1844_v13 = vld [vmem:[#allocation2 + $0xd0] sm:$0xff]  }
  0x2c   :  { %1635 = vmatpush3.bf16.msra.mxu1 %v1827_v24 }
  0x2d   :  { %1617 = vmatpush3.bf16.msra.mxu0 %v1818_v16  ;;  %1636 = vmatprep.subr.bf16.mxu1 %v1828_v25 }
  0x2e   :  { %1618 = vmatprep.subr.bf16.mxu0 %v1819_v21 }
  0x30   :  { %1637 = vmatpush3.bf16.msra.mxu1 %v1828_v25 }
  0x31   :  { %1619 = vmatpush3.bf16.msra.mxu0 %v1819_v21  ;;  %1638 = vmatprep.subr.bf16.mxu1 %v1829_v26 }
  0x34   :  { %1621 = vmatmul.mubr.bf16.vlgmr.msra.gmra.mrb[0].mxu0 %v1821_v23  ;;  %1639 = vmatpush3.bf16.msra.mxu1 %v1829_v26 }
  0x37   :  { %1641 = vmatmul.mubr.bf16.vlgmr.msra.gmra.mrb[0].mxu1 %v1831_v28 }
  0x38   :  { %1644 = vmatprep.mubr.bf16.mxu1 %v1832_v30 }
  0x3f   :  { %1645 = vmatmul.mubr.bf16.gmra.mrb[4].mxu1 %v1833_v31 }
  0x94   :  { %v365_v39 = vpop.permute.xlu1 %364 }
  0x95   :  { %v359_v33 = vpop.permute.xlu0 %358  ;;  %vm383_vm3 = vcmp.eq.s32.totalorder %v348_v32, %v365_v39 }
  0x96   :  { %vm381_vm0 = vcmp.eq.s32.totalorder %v348_v32, %v359_v33  ;;  %v1430_v54 = vsel %vm383_vm3, 1.0, %v1902_v34 }
  0x97   :  { %v1428_v35 = vsel %vm381_vm0, 1.0, %v1902_v34 }
  0x98   :  { %v368_v41 = vpop.permute.xlu1 %367 }
  0x99   :  { %v362_v36 = vpop.permute.xlu0 %361  ;;  %vm384_vm4 = vcmp.eq.s32.totalorder %v348_v32, %v368_v41 }
  0x9a   :  { %vm382_vm1 = vcmp.eq.s32.totalorder %v348_v32, %v362_v36  ;;  %v1431_v55 = vsel %vm384_vm4, 1.0, %v1902_v34 }
  0x9b   :  { %v1429_v37 = vsel %vm382_vm1, 1.0, %v1902_v34  ;;  %v2023_v60 = vpack.c.bf16 %v1431_v55, %v1430_v54 }
  0x9c   :  { %v2000_v38 = vpack.c.bf16 %v1429_v37, %v1428_v35  ;;  %v374_v51 = vpop.permute.xlu1 %373 }
  0x9d   :  { %v371_v52 = vpop.permute.xlu0 %370  ;;  %vm386_vm5 = vcmp.eq.s32.totalorder %v348_v32, %v374_v51 }
  0x9e   :  { %1652 = vmatprep.mubr.msk.bf16.mxu0 %vm444_vm2, %v2000_v38  ;;  %vm385_vm6 = vcmp.eq.s32.totalorder %v348_v32, %v371_v52  ;;  %v1433_v56 = vsel %vm386_vm5, 1.0, %v1902_v34  ;;  %v412_v52 = vadd.s32 16, %v2037_v9 }
  0x9f   :  { %v1432_v57 = vsel %vm385_vm6, 1.0, %v1902_v34 }
  0xa0   :  { %v380_v58 = vpop.permute.xlu1 %379  ;;  %v2025_v61 = vpack.c.bf16 %v1433_v56, %v1432_v57  ;;  %vm421_vm12 = vcmp.eq.s32.totalorder %v412_v52, %v1436_v11 }
  0xa1   :  { %v377_v59 = vpop.permute.xlu0 %376  ;;  %vm388_vm7 = vcmp.eq.s32.totalorder %v348_v32, %v380_v58 }
  0xa2   :  { %vm387_vm8 = vcmp.eq.s32.totalorder %v348_v32, %v377_v59  ;;  %v1435_v62 = vsel %vm388_vm7, 1.0, %v1902_v34 }
  0xa3   :  { %v1434_v63 = vsel %vm387_vm8, 1.0, %v1902_v34 }
  0xa4   :  { %v2033_v0 = vpack.c.bf16 %v1435_v62, %v1434_v63  ;;  %v1439_v62 = vsel %vm421_vm12, 1.0, %v1902_v34 }
 0x107   :  { %v1622_v40 = vpop.f32.mrb[0].mxu0 }
 0x108   :  { %v162_v43 = vpop.f32.mrb[1].mxu0  ;;  %v2013_v49 = vadd.f32 %v1622_v40, %v1403_v42 }
 0x109   :  { %v1623_v44 = vpop.f32.mrb[2].mxu0  ;;  %v2007_v46 = vadd.f32 %v1403_v42, %v162_v43 }
 0x10a   :  { %v165_v45 = vpop.f32.mrb[3].mxu0  ;;  %v2009_v47 = vadd.f32 %v1623_v44, %v1403_v42  ;;  %v1642_v1 = vpop.f32.mrb[0].mxu1 }
 0x10b   :  { %v2011_v48 = vadd.f32 %v1403_v42, %v165_v45  ;;  %v316_v2 = vpop.f32.mrb[1].mxu1  ;;  %v2053_v16 = vadd.f32 %v1642_v1, %v1415_v15  ;;  %v1834_v1 = vld [vmem:[#allocation2 + $0x80] sm:$0xff]  }
 0x10c   :  { %v443_v53 = vpack.c.bf16 %v2009_v47, %v2013_v49  ;;  %v1643_v3 = vpop.f32.mrb[2].mxu1  ;;  %v2055_v17 = vadd.f32 %v1415_v15, %v316_v2 }
 0x10d   :  { %v442_v50 = vpack.c.bf16 %v2011_v48, %v2007_v46  ;;  %v319_v4 = vpop.f32.mrb[3].mxu1  ;;  %v2057_v19 = vadd.f32 %v1643_v3, %v1415_v15  ;;  %v1835_v3 = vld [vmem:[#allocation2 + $0x88] sm:$0xff]  }
 0x10e   :  { %v2060_v22 = vadd.f32 %v1415_v15, %v319_v4  ;;  %v1836_v4 = vld [vmem:[#allocation2 + $0x90] sm:$0xff]  }
 0x10f   :  { %1648 = vmatprep.subr.bf16.mxu0 %v442_v50 }
 0x110   :  { %1649 = vmatpush3.bf16.msra.mxu0 %v442_v50 }
 0x111   :  { %1650 = vmatprep.subr.bf16.mxu0 %v443_v53 }
 0x112   :  { %v1646_v5 = vpop.f32.mrb[4].mxu1 }
 0x113   :  { %v332_v6 = vpop.f32.mrb[5].mxu1  ;;  %v2065_v30 = vadd.f32 %v1646_v5, %v1415_v15  ;;  %v1837_v5 = vld [vmem:[#allocation2 + $0x98] sm:$0xff]  }
 0x114   :  { %1651 = vmatpush3.bf16.msra.mxu0 %v443_v53  ;;  %v1647_v7 = vpop.f32.mrb[6].mxu1  ;;  %v2067_v33 = vadd.f32 %v1415_v15, %v332_v6  ;;  %v413_v53 = vadd.s32 24, %v2037_v9  ;;  %v1838_v6 = vld [vmem:[#allocation2 + $0xa0] sm:$0xff]  }
 0x115   :  { %v335_v8 = vpop.f32.mrb[7].mxu1  ;;  %v2069_v39 = vadd.f32 %v1647_v7, %v1415_v15  ;;  %v1839_v7 = vld [vmem:[#allocation2 + $0xa8] sm:$0xff]  }
 0x116   :  { %v2072_v42 = vadd.f32 %v1415_v15, %v335_v8  ;;  %vm422_vm13 = vcmp.eq.s32.totalorder %v413_v53, %v1436_v11  ;;  %v1840_v8 = vld [vmem:[#allocation2 + $0xb0] sm:$0xff]   ;;  %v1842_v11 = vld [vmem:[#allocation2 + $0xc0] sm:$0xff]   ;;  %v1845_v15 = vld [vmem:[#allocation2 + $0xd8] sm:$0xff]  }
 0x117   :  { %1653 = vmatmul.mubr.msk.bf16.vlgmr.msra.gmra.mrb[4].mxu0 %vm444_vm2, %v2023_v60  ;;  %v1440_v63 = vsel %vm422_vm13, 1.0, %v1902_v34  ;;  %1692 = vmatprep.subr.bf16.mxu1 %v1842_v11 }
 0x118   :  { %1656 = vmatprep.mubr.msk.bf16.mxu0 %vm444_vm2, %v2025_v61  ;;  %v2081_v2 = vpack.c.bf16 %v1440_v63, %v1439_v62  ;;  %1693 = vmatpush3.bf16.msra.mxu1 %v1842_v11  ;;  %v1851_v11 = vld [vmem:[#allocation2 + $0x108] sm:$0xff]  }
 0x119   :  { %1694 = vmatprep.subr.bf16.mxu1 %v1843_v12 }
 0x11c   :  { %1695 = vmatpush3.bf16.msra.mxu1 %v1843_v12  ;;  %v1852_v12 = vld [vmem:[#allocation2 + $0x110] sm:$0xff]  }
 0x11d   :  { %1696 = vmatprep.subr.bf16.mxu1 %v1844_v13 }
 0x11f   :  { %1657 = vmatmul.mubr.msk.bf16.gmra.mrb[8].mxu0 %vm444_vm2, %v2033_v0 }
 0x120   :  { %1668 = vmatprep.mubr.msk.bf16.mxu0 %vm534_vm11, %v2046_v14  ;;  %1697 = vmatpush3.bf16.msra.mxu1 %v1844_v13  ;;  %v1853_v13 = vld [vmem:[#allocation2 + $0x118] sm:$0xff]  }
 0x121   :  { %1698 = vmatprep.subr.bf16.mxu1 %v1845_v15 }
 0x124   :  { %1699 = vmatpush3.bf16.msra.mxu1 %v1845_v15 }
 0x1ea   :  { %v1654_v18 = vpop.f32.mrb[4].mxu0 }
 0x1eb   :  { %v500_v20 = vadd.f32 %v1654_v18, %v2053_v16  ;;  %v491_v21 = vpop.f32.mrb[5].mxu0  ;;  %v1846_v18 = vld [vmem:[#allocation2 + $0xe0] sm:$0xff]  }
 0x1ec   :  { %v492_v23 = vadd.f32 %v491_v21, %v2055_v17  ;;  %v1655_v24 = vpop.f32.mrb[6].mxu0  ;;  %1700 = vmatprep.subr.bf16.mxu1 %v1846_v18 }
 0x1ed   :  { %v503_v25 = vadd.f32 %v1655_v24, %v2057_v19  ;;  %v494_v26 = vpop.f32.mrb[7].mxu0  ;;  %v524_v28 = vmax.f32 %v500_v20, 0.0  ;;  %v1847_v20 = vld [vmem:[#allocation2 + $0xe8] sm:$0xff]   ;;  %1701 = vmatpush3.bf16.msra.mxu1 %v1846_v18 }
 0x1ee   :  { %v495_v27 = vadd.f32 %v494_v26, %v2060_v22  ;;  %v522_v31 = vmax.f32 %v492_v23, 0.0  ;;  %1702 = vmatprep.subr.bf16.mxu1 %v1847_v20 }
 0x1ef   :  { %v525_v29 = vmax.f32 %v503_v25, 0.0 }
 0x1f0   :  { %v523_v32 = vmax.f32 %v495_v27, 0.0 }
 0x1f1   :  { %v531_v35 = vpack.c.bf16 %v525_v29, %v524_v28  ;;  %1703 = vmatpush3.bf16.msra.mxu1 %v1847_v20 }
 0x1f2   :  { %v530_v36 = vpack.c.bf16 %v523_v32, %v522_v31  ;;  %v1658_v37 = vpop.f32.mrb[8].mxu0 }
 0x1f3   :  { %v516_v40 = vadd.f32 %v1658_v37, %v2065_v30  ;;  %v507_v41 = vpop.f32.mrb[9].mxu0 }
 0x1f4   :  { %v508_v43 = vadd.f32 %v507_v41, %v2067_v33  ;;  %v1659_v44 = vpop.f32.mrb[10].mxu0  ;;  %1660 = vmatprep.subr.bf16.mxu0 %v530_v36 }
 0x1f5   :  { %v519_v45 = vadd.f32 %v1659_v44, %v2069_v39  ;;  %v510_v50 = vpop.f32.mrb[11].mxu0  ;;  %1661 = vmatpush3.bf16.msra.mxu0 %v530_v36  ;;  %v528_v54 = vmax.f32 %v516_v40, 0.0  ;;  %v1849_v36 = vld [vmem:[#allocation2 + $0xf8] sm:$0xff]  }
 0x1f6   :  { %v511_v51 = vadd.f32 %v510_v50, %v2072_v42  ;;  %1662 = vmatprep.subr.bf16.mxu0 %v531_v35  ;;  %v526_v56 = vmax.f32 %v508_v43, 0.0 }
 0x1f7   :  { %v529_v55 = vmax.f32 %v519_v45, 0.0 }
 0x1f8   :  { %v527_v57 = vmax.f32 %v511_v51, 0.0 }
 0x1f9   :  { %v533_v58 = vpack.c.bf16 %v529_v55, %v528_v54  ;;  %1663 = vmatpush3.bf16.msra.mxu0 %v531_v35  ;;  %v1848_v35 = vld [vmem:[#allocation2 + $0xf0] sm:$0xff]   ;;  %v1460_v54 = vld [vmem:[%s2181_s6 + $0x3] ss:$0 sm:$0xff] }
 0x1fa   :  { %v532_v59 = vpack.c.bf16 %v527_v57, %v526_v56  ;;  %1704 = vmatprep.subr.bf16.mxu1 %v1848_v35 }
 0x1fb   :  { %1705 = vmatpush3.bf16.msra.mxu1 %v1848_v35 }
 0x1fc   :  { %1664 = vmatprep.subr.bf16.mxu0 %v532_v59  ;;  %1706 = vmatprep.subr.bf16.mxu1 %v1849_v36 }
 0x1fd   :  { %1665 = vmatpush3.bf16.msra.mxu0 %v532_v59 }
 0x1fe   :  { %1666 = vmatprep.subr.bf16.mxu0 %v533_v58 }
 0x1ff   :  { %1707 = vmatpush3.bf16.msra.mxu1 %v1849_v36 }
 0x201   :  { %1667 = vmatpush3.bf16.msra.mxu0 %v533_v58 }
 0x202   :  { %1672 = vmatprep.subr.bf16.mxu0 %v1834_v1 }
 0x204   :  { %1669 = vmatmul.mubr.msk.bf16.vlgmr.msra.gmra.mrb[12].mxu0 %vm534_vm11, %v2081_v2 }
 0x205   :  { %1673 = vmatpush3.bf16.msra.mxu0 %v1834_v1 }
 0x206   :  { %1674 = vmatprep.subr.bf16.mxu0 %v1835_v3 }
 0x209   :  { %1675 = vmatpush3.bf16.msra.mxu0 %v1835_v3 }
 0x20a   :  { %1676 = vmatprep.subr.bf16.mxu0 %v1836_v4 }
 0x20d   :  { %1677 = vmatpush3.bf16.msra.mxu0 %v1836_v4 }
 0x20e   :  { %1678 = vmatprep.subr.bf16.mxu0 %v1837_v5 }
 0x211   :  { %1679 = vmatpush3.bf16.msra.mxu0 %v1837_v5 }
 0x212   :  { %1680 = vmatprep.subr.bf16.mxu0 %v1838_v6 }
 0x215   :  { %1681 = vmatpush3.bf16.msra.mxu0 %v1838_v6 }
 0x216   :  { %1682 = vmatprep.subr.bf16.mxu0 %v1839_v7 }
 0x219   :  { %1683 = vmatpush3.bf16.msra.mxu0 %v1839_v7 }
 0x21a   :  { %1684 = vmatprep.subr.bf16.mxu0 %v1840_v8 }
 0x21d   :  { %1685 = vmatpush3.bf16.msra.mxu0 %v1840_v8 }
 0x21e   :  { %1686 = vmatprep.subr.bf16.mxu0 %v1841_v10 }
 0x221   :  { %1687 = vmatpush3.bf16.msra.mxu0 %v1841_v10  ;;  %v1850_v10 = vld [vmem:[#allocation2 + $0x100] sm:$0xff]  }
 0x222   :  { %1736 = vmatprep.subr.bf16.mxu1 %v1850_v10 }
 0x2d7   :  { %v1670_v21 = vpop.f32.mrb[12].mxu0 }
 0x2d8   :  { %v575_v23 = vpop.f32.mrb[13].mxu0  ;;  %v592_v25 = vadd.f32 %v1670_v21, %v2013_v49 }
 0x2d9   :  { %v1671_v24 = vpop.f32.mrb[14].mxu0  ;;  %v590_v28 = vadd.f32 %v575_v23, %v2007_v46 }
 0x2da   :  { %v593_v26 = vadd.f32 %v1671_v24, %v2009_v47  ;;  %v578_v27 = vpop.f32.mrb[15].mxu0  ;;  %v1450_v47 = vld [vmem:[%s2181_s6 + $0x2] ss:$0 sm:$0xff] }
 0x2db   :  { %v591_v29 = vadd.f32 %v578_v27, %v2011_v48 }
 0x2dc   :  { %v595_v31 = vpack.c.bf16 %v593_v26, %v592_v25 }
 0x2dd   :  { %v594_v32 = vpack.c.bf16 %v591_v29, %v590_v28 }
 0x2df   :  { %1688 = vmatprep.mubr.bf16.mxu0 %v594_v32 }
 0x2e0   :  { %1689 = vmatmul.mubr.bf16.vlgmr.msra.gmra.mrb[16].mxu0 %v595_v31 }
 0x2e1   :  { %1716 = vmatprep.mubr.msk.bf16.mxu0 %vm444_vm2, %v2000_v38 }
 0x3b3   :  { %v1690_v46 = vpop.f32.mrb[16].mxu0 }
 0x3b4   :  { %v712_v49 = vadd.f32 %v1690_v46, %v1450_v47  ;;  %v703_v48 = vpop.f32.mrb[17].mxu0 }
 0x3b5   :  { %v704_v37 = vadd.f32 %v1450_v47, %v703_v48  ;;  %v1691_v40 = vpop.f32.mrb[18].mxu0 }
 0x3b6   :  { %v715_v41 = vadd.f32 %v1691_v40, %v1450_v47  ;;  %v706_v43 = vpop.f32.mrb[19].mxu0  ;;  %v720_v45 = vmax.f32 %v712_v49, 0.0 }
 0x3b7   :  { %v707_v44 = vadd.f32 %v1450_v47, %v706_v43  ;;  %v718_v50 = vmax.f32 %v704_v37, 0.0  ;;  %v1860_v43 = vld [vmem:[#allocation2 + $0x150] sm:$0xff]  }
 0x3b8   :  { %v721_v38 = vmax.f32 %v715_v41, 0.0 }
 0x3b9   :  { %v719_v51 = vmax.f32 %v707_v44, 0.0  ;;  %v1861_v44 = vld [vmem:[#allocation2 + $0x158] sm:$0xff]  }
 0x3ba   :  { %v723_v52 = vpack.c.bf16 %v721_v38, %v720_v45  ;;  %v1863_v45 = vld [vmem:[#allocation2 + $0x168] sm:$0xff]  }
 0x3bb   :  { %v722_v53 = vpack.c.bf16 %v719_v51, %v718_v50 }
 0x3bd   :  { %1708 = vmatprep.mubr.bf16.mxu1 %v722_v53 }
 0x3be   :  { %1709 = vmatmul.mubr.bf16.vlgmr.msra.gmra.mrb[8].mxu1 %v723_v52 }
 0x3bf   :  { %1737 = vmatpush3.bf16.msra.mxu1 %v1850_v10 }
 0x3c0   :  { %1738 = vmatprep.subr.bf16.mxu1 %v1851_v11 }
 0x3c3   :  { %1739 = vmatpush3.bf16.msra.mxu1 %v1851_v11 }
 0x3c4   :  { %1740 = vmatprep.subr.bf16.mxu1 %v1852_v12 }
 0x3c7   :  { %1741 = vmatpush3.bf16.msra.mxu1 %v1852_v12 }
 0x3c8   :  { %1742 = vmatprep.subr.bf16.mxu1 %v1853_v13 }
 0x3cb   :  { %1743 = vmatpush3.bf16.msra.mxu1 %v1853_v13 }
 0x491   :  { %v1710_v55 = vpop.f32.mrb[8].mxu1 }
 0x492   :  { %v831_v56 = vpop.f32.mrb[9].mxu1  ;;  %v2101_v63 = vadd.f32 %v1710_v55, %v1460_v54 }
 0x493   :  { %v2097_v57 = vadd.f32 %v1460_v54, %v831_v56  ;;  %v1711_v58 = vpop.f32.mrb[10].mxu1 }
 0x494   :  { %v2099_v59 = vadd.f32 %v1711_v58, %v1460_v54  ;;  %v834_v62 = vpop.f32.mrb[11].mxu1  ;;  %v848_v6 = vmax.f32 %v2101_v63, 0.0 }
 0x495   :  { %v2103_v1 = vadd.f32 %v1460_v54, %v834_v62  ;;  %v846_v3 = vmax.f32 %v2097_v57, 0.0 }
 0x496   :  { %v849_v4 = vmax.f32 %v2099_v59, 0.0  ;;  %v1476_v59 = vld [vmem:[%s2181_s6 + $0x4] ss:$0 sm:$0xff] }
 0x497   :  { %v847_v5 = vmax.f32 %v2103_v1, 0.0 }
 0x498   :  { %v851_v8 = vpack.c.bf16 %v849_v4, %v848_v6 }
 0x499   :  { %v850_v7 = vpack.c.bf16 %v847_v5, %v846_v3 }
 0x49b   :  { %1712 = vmatprep.subr.bf16.mxu0 %v850_v7 }
 0x49c   :  { %1713 = vmatpush3.bf16.msra.mxu0 %v850_v7  ;;  %v1864_v7 = vld [vmem:[#allocation2 + $0x170] sm:$0xff]  }
 0x49d   :  { %1714 = vmatprep.subr.bf16.mxu0 %v851_v8 }
 0x4a0   :  { %1715 = vmatpush3.bf16.msra.mxu0 %v851_v8  ;;  %v1865_v8 = vld [vmem:[#allocation2 + $0x178] sm:$0xff]  }
 0x4a3   :  { %1717 = vmatmul.mubr.msk.bf16.vlgmr.msra.gmra.mrb[20].mxu0 %vm444_vm2, %v2023_v60  ;;  %v1854_v60 = vld [vmem:[#allocation2 + $0x120] sm:$0xff]  }
 0x4a4   :  { %1720 = vmatprep.mubr.msk.bf16.mxu0 %vm444_vm2, %v2025_v61  ;;  %1744 = vmatprep.subr.bf16.mxu1 %v1854_v60  ;;  %v1855_v61 = vld [vmem:[#allocation2 + $0x128] sm:$0xff]  }
 0x4a5   :  { %1745 = vmatpush3.bf16.msra.mxu1 %v1854_v60 }
 0x4a6   :  { %1746 = vmatprep.subr.bf16.mxu1 %v1855_v61 }
 0x4a9   :  { %1747 = vmatpush3.bf16.msra.mxu1 %v1855_v61 }
 0x4ab   :  { %1721 = vmatmul.mubr.msk.bf16.gmra.mrb[24].mxu0 %vm444_vm2, %v2033_v0 }
 0x4ac   :  { %1732 = vmatprep.mubr.msk.bf16.mxu0 %vm534_vm11, %v2046_v14 }
 0x576   :  { %v1718_v0 = vpop.f32.mrb[20].mxu0 }
 0x577   :  { %v895_v14 = vadd.f32 %v1718_v0, %v2053_v16  ;;  %v886_v15 = vpop.f32.mrb[21].mxu0 }
 0x578   :  { %v887_v18 = vadd.f32 %v886_v15, %v2055_v17  ;;  %v1719_v20 = vpop.f32.mrb[22].mxu0 }
 0x579   :  { %v898_v21 = vadd.f32 %v1719_v20, %v2057_v19  ;;  %v889_v23 = vpop.f32.mrb[23].mxu0  ;;  %v919_v25 = vmax.f32 %v895_v14, 0.0  ;;  %v1486_v14 = vld [vmem:[%s2181_s6 + $0x5] ss:$0 sm:$0xff] }
 0x57a   :  { %v890_v24 = vadd.f32 %v889_v23, %v2060_v22  ;;  %v917_v27 = vmax.f32 %v887_v18, 0.0 }
 0x57b   :  { %v920_v26 = vmax.f32 %v898_v21, 0.0 }
 0x57c   :  { %v918_v28 = vmax.f32 %v890_v24, 0.0 }
 0x57d   :  { %v926_v29 = vpack.c.bf16 %v920_v26, %v919_v25 }
 0x57e   :  { %v925_v31 = vpack.c.bf16 %v918_v28, %v917_v27  ;;  %v1722_v32 = vpop.f32.mrb[24].mxu0  ;;  %v1441_v27 = vld [vmem:[%s2179_s4] ss:$0 sm:$0xff] }
 0x57f   :  { %v911_v35 = vadd.f32 %v1722_v32, %v2065_v30  ;;  %v902_v36 = vpop.f32.mrb[25].mxu0  ;;  %v1856_v30 = vld [vmem:[#allocation2 + $0x130] sm:$0xff]   ;;  %vm438_vm15 = vcmp.eq.s32.totalorder %v2037_v9, %v1441_v27 }
 0x580   :  { %v903_v16 = vadd.f32 %v902_v36, %v2067_v33  ;;  %v1723_v47 = vpop.f32.mrb[26].mxu0  ;;  %1724 = vmatprep.subr.bf16.mxu0 %v925_v31  ;;  %1748 = vmatprep.subr.bf16.mxu1 %v1856_v30  ;;  %v1857_v33 = vld [vmem:[#allocation2 + $0x138] sm:$0xff]   ;;  %v1868_v9 = vld [vmem:[#allocation2 + $0x190] sm:$0xff]  }
 0x581   :  { %v914_v17 = vadd.f32 %v1723_v47, %v2069_v39  ;;  %v905_v19 = vpop.f32.mrb[27].mxu0  ;;  %1725 = vmatpush3.bf16.msra.mxu0 %v925_v31  ;;  %v923_v46 = vmax.f32 %v911_v35, 0.0  ;;  %1749 = vmatpush3.bf16.msra.mxu1 %v1856_v30  ;;  %v1858_v39 = vld [vmem:[#allocation2 + $0x140] sm:$0xff]  }
 0x582   :  { %v906_v22 = vadd.f32 %v905_v19, %v2072_v42  ;;  %1726 = vmatprep.subr.bf16.mxu0 %v926_v29  ;;  %v921_v48 = vmax.f32 %v903_v16, 0.0  ;;  %1750 = vmatprep.subr.bf16.mxu1 %v1857_v33  ;;  %v1859_v42 = vld [vmem:[#allocation2 + $0x148] sm:$0xff]   ;;  %v1442_v16 = vsel %vm438_vm15, 1.0, %v1902_v34 }
 0x583   :  { %v924_v49 = vmax.f32 %v914_v17, 0.0  ;;  %v441_v47 = vpack.c.bf16 %v1442_v16, %v1442_v16  ;;  %v1866_v17 = vld [vmem:[#allocation2 + $0x180] sm:$0xff]   ;;  %v1867_v19 = vld [vmem:[#allocation2 + $0x188] sm:$0xff]  }
 0x584   :  { %v922_v37 = vmax.f32 %v906_v22, 0.0  ;;  %v1869_v22 = vld [vmem:[#allocation2 + $0x198] sm:$0xff]  }
 0x585   :  { %v928_v40 = vpack.c.bf16 %v924_v49, %v923_v46  ;;  %1727 = vmatpush3.bf16.msra.mxu0 %v926_v29  ;;  %1751 = vmatpush3.bf16.msra.mxu1 %v1857_v33  ;;  %v1870_v46 = vld [vmem:[#allocation2 + $0x1a0] sm:$0xff]   ;;  %v1871_v49 = vld [vmem:[#allocation2 + $0x1a8] sm:$0xff]  }
 0x586   :  { %v927_v41 = vpack.c.bf16 %v922_v37, %v921_v48  ;;  %1776 = vmatprep.subr.bf16.mxu1 %v1902_v34  ;;  %v1872_v48 = vld [vmem:[#allocation2 + $0x1b0] sm:$0xff]   ;;  %v1873_v37 = vld [vmem:[#allocation2 + $0x1b8] sm:$0xff]  }
 0x588   :  { %1728 = vmatprep.subr.bf16.mxu0 %v927_v41 }
 0x589   :  { %1729 = vmatpush3.bf16.msra.mxu0 %v927_v41 }
 0x58a   :  { %1730 = vmatprep.subr.bf16.mxu0 %v928_v40 }
 0x58d   :  { %1731 = vmatpush3.bf16.msra.mxu0 %v928_v40 }
 0x58e   :  { %1756 = vmatprep.subr.bf16.mxu0 %v1858_v39 }
 0x590   :  { %1733 = vmatmul.mubr.msk.bf16.vlgmr.msra.gmra.mrb[28].mxu0 %vm534_vm11, %v2081_v2  ;;  %v1862_v2 = vld [vmem:[#allocation2 + $0x160] sm:$0xff]  }
 0x591   :  { %1757 = vmatpush3.bf16.msra.mxu0 %v1858_v39 }
 0x592   :  { %1758 = vmatprep.subr.bf16.mxu0 %v1859_v42 }
 0x595   :  { %1759 = vmatpush3.bf16.msra.mxu0 %v1859_v42  ;;  %v1497_v42 = vld [vmem:[%s2181_s6 + $0x6] ss:$0 sm:$0xff] }
 0x596   :  { %1760 = vmatprep.subr.bf16.mxu0 %v1860_v43 }
 0x599   :  { %1761 = vmatpush3.bf16.msra.mxu0 %v1860_v43 }
 0x59a   :  { %1762 = vmatprep.subr.bf16.mxu0 %v1861_v44 }
 0x59d   :  { %1763 = vmatpush3.bf16.msra.mxu0 %v1861_v44 }
 0x59e   :  { %1764 = vmatprep.subr.bf16.mxu0 %v1862_v2 }
 0x5a1   :  { %1765 = vmatpush3.bf16.msra.mxu0 %v1862_v2 }
 0x5a2   :  { %1766 = vmatprep.subr.bf16.mxu0 %v1863_v45 }
 0x5a5   :  { %1767 = vmatpush3.bf16.msra.mxu0 %v1863_v45 }
 0x5a6   :  { %1768 = vmatprep.subr.bf16.mxu0 %v1864_v7 }
 0x5a9   :  { %1769 = vmatpush3.bf16.msra.mxu0 %v1864_v7 }
 0x5aa   :  { %1770 = vmatprep.subr.bf16.mxu0 %v1865_v8 }
 0x5ad   :  { %1771 = vmatpush3.bf16.msra.mxu0 %v1865_v8 }
 0x663   :  { %v1734_v38 = vpop.f32.mrb[28].mxu0 }
 0x664   :  { %v963_v50 = vpop.f32.mrb[29].mxu0  ;;  %v980_v52 = vadd.f32 %v1734_v38, %v848_v6 }
 0x665   :  { %v1735_v51 = vpop.f32.mrb[30].mxu0  ;;  %v978_v55 = vadd.f32 %v963_v50, %v846_v3 }
 0x666   :  { %v981_v53 = vadd.f32 %v1735_v51, %v849_v4  ;;  %v966_v54 = vpop.f32.mrb[31].mxu0 }
 0x667   :  { %v979_v56 = vadd.f32 %v966_v54, %v847_v5 }
 0x668   :  { %v983_v58 = vpack.c.bf16 %v981_v53, %v980_v52 }
 0x669   :  { %v982_v62 = vpack.c.bf16 %v979_v56, %v978_v55 }
 0x66b   :  { %1752 = vmatprep.mubr.bf16.mxu1 %v982_v62 }
 0x66c   :  { %1753 = vmatmul.mubr.bf16.vlgmr.msra.gmra.mrb[12].mxu1 %v983_v58 }
 0x66d   :  { %1780 = vmatprep.mubr.msk.bf16.mxu1 %vm1903_vm14, %v1902_v34 }
 0x73f   :  { %v1754_v63 = vpop.f32.mrb[12].mxu1 }
 0x740   :  { %v1100_v57 = vadd.f32 %v1754_v63, %v1476_v59  ;;  %v1091_v3 = vpop.f32.mrb[13].mxu1 }
 0x741   :  { %v1092_v4 = vadd.f32 %v1476_v59, %v1091_v3  ;;  %v1755_v1 = vpop.f32.mrb[14].mxu1 }
 0x742   :  { %v1103_v5 = vadd.f32 %v1755_v1, %v1476_v59  ;;  %v1094_v6 = vpop.f32.mrb[15].mxu1  ;;  %v1108_v11 = vmax.f32 %v1100_v57, 0.0 }
 0x743   :  { %v1095_v10 = vadd.f32 %v1476_v59, %v1094_v6  ;;  %v1106_v13 = vmax.f32 %v1092_v4, 0.0 }
 0x744   :  { %v1109_v12 = vmax.f32 %v1103_v5, 0.0 }
 0x745   :  { %v1107_v60 = vmax.f32 %v1095_v10, 0.0 }
 0x746   :  { %v1111_v61 = vpack.c.bf16 %v1109_v12, %v1108_v11 }
 0x747   :  { %v1110_v0 = vpack.c.bf16 %v1107_v60, %v1106_v13 }
 0x749   :  { %1772 = vmatprep.mubr.bf16.mxu0 %v1110_v0 }
 0x74a   :  { %1773 = vmatmul.mubr.bf16.vlgmr.msra.gmra.mrb[32].mxu0 %v1111_v61 }
 0x81d   :  { %v1774_v15 = vpop.f32.mrb[32].mxu0 }
 0x81e   :  { %v1228_v18 = vadd.f32 %v1774_v15, %v1486_v14  ;;  %v1219_v20 = vpop.f32.mrb[33].mxu0 }
 0x81f   :  { %v1220_v21 = vadd.f32 %v1486_v14, %v1219_v20  ;;  %v1775_v23 = vpop.f32.mrb[34].mxu0 }
 0x820   :  { %v1231_v24 = vadd.f32 %v1775_v23, %v1486_v14  ;;  %v1222_v25 = vpop.f32.mrb[35].mxu0  ;;  %v1236_v28 = vmax.f32 %v1228_v18, 0.0 }
 0x821   :  { %v1223_v26 = vadd.f32 %v1486_v14, %v1222_v25  ;;  %v1234_v31 = vmax.f32 %v1220_v21, 0.0 }
 0x822   :  { %v1237_v29 = vmax.f32 %v1231_v24, 0.0 }
 0x823   :  { %v1235_v32 = vmax.f32 %v1223_v26, 0.0 }
 0x824   :  { %v1239_v35 = vpack.c.bf16 %v1237_v29, %v1236_v28 }
 0x825   :  { %v1238_v36 = vpack.c.bf16 %v1235_v32, %v1234_v31 }
 0x827   :  { %1777 = vmatpush3.bf16.msra.mxu1 %v1238_v36 }
 0x828   :  { %1778 = vmatprep.subr.bf16.mxu1 %v1902_v34 }
 0x82b   :  { %1779 = vmatpush3.bf16.msra.mxu1 %v1239_v35 }
 0x82c   :  { %1784 = vmatprep.subr.bf16.mxu1 %v1902_v34 }
 0x82e   :  { %1781 = vmatmul.mubr.msk.bf16.vlgmr.msra.gmra.mrb[16].mxu1 %vm444_vm2, %v441_v47 }
 0x82f   :  { %1785 = vmatpush3.bf16.msra.mxu1 %v1866_v17  ;;  %1800 = vmatprep.mubr.msk.bf16.mxu1 %vm1903_vm14, %v1902_v34 }
 0x830   :  { %1786 = vmatprep.subr.bf16.mxu1 %v1902_v34 }
 0x833   :  { %1787 = vmatpush3.bf16.msra.mxu1 %v1867_v19 }
 0x834   :  { %1788 = vmatprep.subr.bf16.mxu1 %v1902_v34 }
 0x837   :  { %1789 = vmatpush3.bf16.msra.mxu1 %v1868_v9 }
 0x838   :  { %1790 = vmatprep.subr.bf16.mxu1 %v1902_v34 }
 0x83b   :  { %1791 = vmatpush3.bf16.msra.mxu1 %v1869_v22 }
 0x83c   :  { %1792 = vmatprep.subr.bf16.mxu1 %v1902_v34 }
 0x83f   :  { %1793 = vmatpush3.bf16.msra.mxu1 %v1870_v46 }
 0x840   :  { %1794 = vmatprep.subr.bf16.mxu1 %v1902_v34 }
 0x843   :  { %1795 = vmatpush3.bf16.msra.mxu1 %v1871_v49 }
 0x844   :  { %1796 = vmatprep.subr.bf16.mxu1 %v1902_v34 }
 0x847   :  { %1797 = vmatpush3.bf16.msra.mxu1 %v1872_v48 }
 0x848   :  { %1798 = vmatprep.subr.bf16.mxu1 %v1902_v34 }
 0x84b   :  { %1799 = vmatpush3.bf16.msra.mxu1 %v1873_v37 }
 0x901   :  { %v1277_v40 = vpop.f32.mrb[16].mxu1 }
 0x902   :  { %v1283_v41 = vpack.c.bf16 %v1277_v40, %v1277_v40  ;;  %v1782_v30 = vpop.f32.mrb[17].mxu1 }
 0x903   :  { %v1280_v33 = vpop.f32.mrb[18].mxu1 }
 0x904   :  { %v1783_v39 = vpop.f32.mrb[19].mxu1  ;;  %1801 = vmatmul.mubr.bf16.vlgmr.msra.gmra.mrb[20].mxu1 %v1283_v41 }
 0x9d7   :  { %v1391_v43 = vpop.f32.mrb[20].mxu1 }
 0x9d8   :  { %v1392_v44 = vadd.f32 %v1497_v42, %v1391_v43  ;;  %v1802_v2 = vpop.f32.mrb[21].mxu1 }
 0x9d9   :  { %v1394_v45 = vpop.f32.mrb[22].mxu1 }
 0x9da   :  { %1397 = vst [vmem:[%s2182_s7] sm:$0xff] %v1392_v44  ;;  %v1803_v34 = vpop.f32.mrb[23].mxu1 }
 0x9db   :  { %1402 = vsyncpa [#allocation3], 1 }

</bundles_post_ra>
